<compile_context>
chip_gen: v5e
topology: v5e:2x2
jax: 0.10.0
libtpu: 0.0.40
codegen_flags: <defaults>
</compile_context>

<pallas_src>
import functools

import jax
import jax.numpy as jnp
from jax.experimental import pallas as pl
from jax.experimental.pallas import tpu as pltpu

_STEP_VMEM_BUDGET = 30 * 1024 * 1024   # per-grid-step working-set target (fits v7x 64 MiB)


def _round_up(x, m):
    return ((x + m - 1) // m) * m


def _vmem_limit(step_bytes):
    # Ceiling derived from the actual footprint + headroom; sane on all gens.
    return int(min(96 * 1024 * 1024,
                   max(40 * 1024 * 1024, step_bytes + 16 * 1024 * 1024)))


# ----------------------------------------------------------------------------
# Stage 1: shared Linear g (bf16 MXU matmul, f32 accumulation) + L2 normalize.
# ----------------------------------------------------------------------------
def _embed_norm_kernel(x_ref, wgt_ref, bg_ref, out_ref):
    xe = jnp.dot(x_ref[...], wgt_ref[...],
                 preferred_element_type=jnp.float32) + bg_ref[...]
    # F.normalize(dim=1): x / max(||x||, 1e-12) == x * rsqrt(max(sumsq, 1e-24))
    sumsq = jnp.sum(xe * xe, axis=1, keepdims=True)
    inv = jax.lax.rsqrt(jnp.maximum(sumsq, jnp.float32(1e-24)))
    out_ref[...] = (xe * inv).astype(out_ref.dtype)


def _stage1_rows(total_rows, feat, emb, cap):
    rows = min(cap, total_rows)

    def fp(r):   # double-buffered bf16 in/out + resident weight + f32 temp
        return (2 * r * feat * 2 + 2 * feat * emb * 2
                + 2 * r * emb * 2 + r * emb * 4)

    while fp(rows) > _STEP_VMEM_BUDGET and rows > 8 and rows % 16 == 0:
        rows //= 2
    return rows


def _embed_normalize(x_pad_bf16, wg_t_bf16, bg2, tile_rows):
    rows, feat = x_pad_bf16.shape
    emb = wg_t_bf16.shape[1]
    step_bytes = (2 * tile_rows * feat * 2 + 2 * feat * emb * 2
                  + 2 * tile_rows * emb * 2 + tile_rows * emb * 4)
    return pl.pallas_call(
        _embed_norm_kernel,
        out_shape=jax.ShapeDtypeStruct((rows, emb), jnp.bfloat16),
        grid=(rows // tile_rows,),
        in_specs=[pl.BlockSpec((tile_rows, feat), lambda i: (i, 0)),
                  pl.BlockSpec((feat, emb), lambda i: (0, 0)),
                  pl.BlockSpec((1, emb), lambda i: (0, 0))],
        out_specs=pl.BlockSpec((tile_rows, emb), lambda i: (i, 0)),
        compiler_params=pltpu.CompilerParams(
            dimension_semantics=("parallel",),
            vmem_limit_bytes=_vmem_limit(step_bytes)),
    )(x_pad_bf16, wg_t_bf16, bg2)


# ----------------------------------------------------------------------------
# Minerva activation |a|^p * sign(a), specialized on the static p.
# ----------------------------------------------------------------------------
def _ipow(x, n):
    """x**n for static integer n >= 1 via exponentiation by squaring (VPU)."""
    result = None
    base = x
    while n:
        if n & 1:
            result = base if result is None else result * base
        n >>= 1
        if n:
            base = base * base
    return result


def _minerva_activation(a, p_factor):
    if p_factor == 1.0:
        return a
    if p_factor == round(p_factor) and 1.0 < p_factor <= 16.0:
        # s = a * |a|^(p-1): VPU-only, no EUP.
        return a * _ipow(jnp.abs(a), int(round(p_factor)) - 1)
    if (2.0 * p_factor) == round(2.0 * p_factor) and 0.5 <= p_factor <= 16.0:
        # half-integer p: one EUP sqrt + VPU muls instead of exp/log pair.
        k = int(round(p_factor - 0.5))
        abs_a = jnp.abs(a)
        mag = jnp.sqrt(abs_a)
        if k >= 1:
            mag = mag * _ipow(abs_a, k)
        return jnp.sign(a) * mag
    # general p: exp/log pair on the EUP.
    return jnp.sign(a) * jnp.power(jnp.abs(a), jnp.float32(p_factor))


# ----------------------------------------------------------------------------
# Stage 2: similarity + activation + echo accumulation + Linear h + sigmoid.
# ----------------------------------------------------------------------------
def _minerva_tile_kernel(p_factor, tm, dn_resident,
                         xn_ref, dnt_ref, r2_ref, wh_ref, bh_ref,
                         logits_ref, preds_ref, echo_acc):
    mi = pl.program_id(1)

    @pl.when(mi == 0)
    def _init():
        echo_acc[...] = jnp.zeros_like(echo_acc)

    off = pl.multiple_of(mi * tm, tm)
    dnt = dnt_ref[:, pl.ds(off, tm)] if dn_resident else dnt_ref[...]
    # (tn, E) bf16 @ (E, tm) bf16 -> (tn, tm) f32 on the MXU (no RHS transpose).
    a = jnp.dot(xn_ref[...], dnt, preferred_element_type=jnp.float32)
    s = _minerva_activation(a, p_factor)

    # echo += sum_m s * r2 ; padded exemplars have r2 == 0 -> contribute 0.
    r2 = r2_ref[:, pl.ds(off, tm)]
    echo_acc[...] += jnp.sum(s * r2, axis=1, keepdims=True)        # (tn, 1)

    @pl.when(mi == pl.num_programs(1) - 1)
    def _finalize():
        echo = echo_acc[...]                                       # (tn, 1)
        # Linear h (1 input feature) == broadcast outer product; exact C cols.
        logits = echo * wh_ref[...] + bh_ref[...]                  # (tn, C)
        logits_ref[...] = logits
        preds_ref[...] = jax.nn.sigmoid(logits)


def _minerva_echo_call(xn, dn_t, r2_row, wh_row, bh_row, p_factor,
                       tn, tm, dn_resident, step_bytes):
    n_pad, emb = xn.shape
    m_pad = dn_t.shape[1]
    C = wh_row.shape[1]
    grid = (n_pad // tn, m_pad // tm)
    kernel = functools.partial(_minerva_tile_kernel, float(p_factor), tm,
                               dn_resident)
    if dn_resident:
        # Constant index map -> Dn^T is DMA'd into VMEM once and reused.
        dn_spec = pl.BlockSpec((emb, m_pad), lambda i, k: (0, 0))
    else:
        # TODO(synk): if xprof shows exposed DMA here (tiny E), add
        # pipeline_mode=pl.Buffered(3) to deepen the Dn^T stream pipelining.
        dn_spec = pl.BlockSpec((emb, tm), lambda i, k: (0, k))
    return pl.pallas_call(
        kernel,
        out_shape=(jax.ShapeDtypeStruct((n_pad, C), jnp.float32),
                   jax.ShapeDtypeStruct((n_pad, C), jnp.float32)),
        grid=grid,
        in_specs=[pl.BlockSpec((tn, emb), lambda i, k: (i, 0)),    # Xn tile
                  dn_spec,                                         # Dn^T
                  pl.BlockSpec((1, m_pad), lambda i, k: (0, 0)),   # r2 (resident)
                  pl.BlockSpec((1, C), lambda i, k: (0, 0)),       # Wh row
                  pl.BlockSpec((1, C), lambda i, k: (0, 0))],      # bh row
        out_specs=(pl.BlockSpec((tn, C), lambda i, k: (i, 0)),
                   pl.BlockSpec((tn, C), lambda i, k: (i, 0))),
        scratch_shapes=[pltpu.VMEM((tn, 1), jnp.float32)],
        compiler_params=pltpu.CompilerParams(
            dimension_semantics=("parallel", "arbitrary"),
            vmem_limit_bytes=_vmem_limit(step_bytes)),
    )(xn, dn_t, r2_row, wh_row, bh_row)


# ----------------------------------------------------------------------------
# p == 1 fast path: echo = Xn @ (Dn^T r2)  (identity activation collapses).
# ----------------------------------------------------------------------------
def _p1_kernel(xn_ref, w_ref, wh_ref, bh_ref, logits_ref, preds_ref):
    xn = xn_ref[...].astype(jnp.float32)
    echo = jnp.sum(xn * w_ref[...], axis=1, keepdims=True)         # (tn, 1)
    logits = echo * wh_ref[...] + bh_ref[...]                      # (tn, C)
    logits_ref[...] = logits
    preds_ref[...] = jax.nn.sigmoid(logits)


def _p1_echo_call(xn, w_row, wh_row, bh_row, tn):
    n_pad, emb = xn.shape
    C = wh_row.shape[1]
    step_bytes = 2 * tn * emb * 2 + tn * emb * 4 + 4 * tn * max(C, 1) * 4
    return pl.pallas_call(
        _p1_kernel,
        out_shape=(jax.ShapeDtypeStruct((n_pad, C), jnp.float32),
                   jax.ShapeDtypeStruct((n_pad, C), jnp.float32)),
        grid=(n_pad // tn,),
        in_specs=[pl.BlockSpec((tn, emb), lambda i: (i, 0)),
                  pl.BlockSpec((1, emb), lambda i: (0, 0)),
                  pl.BlockSpec((1, C), lambda i: (0, 0)),
                  pl.BlockSpec((1, C), lambda i: (0, 0))],
        out_specs=(pl.BlockSpec((tn, C), lambda i: (i, 0)),
                   pl.BlockSpec((tn, C), lambda i: (i, 0))),
        compiler_params=pltpu.CompilerParams(
            dimension_semantics=("parallel",),
            vmem_limit_bytes=_vmem_limit(step_bytes)),
    )(xn, w_row, wh_row, bh_row)


# ----------------------------------------------------------------------------
# Tile selection (VMEM-budgeted, generation-agnostic).
# ----------------------------------------------------------------------------
def _choose_tiles(N, M, E, C):
    n8 = _round_up(N, 8)
    # tn sets the arithmetic intensity of the streamed-Dn path (tn FLOPs/byte);
    # keep >= 2 row tiles when possible so v7x's 2 TensorCores both get work.
    if n8 > 1024:
        tn = 1024
    elif n8 > 512:
        tn = _round_up((n8 + 1) // 2, 8)
    else:
        tn = n8
    tm = min(1024, _round_up(M, 128))

    def step_bytes(tn_, tm_, m_pad_, resident):
        inter = 4 * tn_ * tm_ * 4                       # f32 a/|a|/s/s*r2 temps
        xn_b = 2 * tn_ * E * 2                          # double-buffered bf16
        dn_b = 2 * E * (m_pad_ if resident else tm_) * 2
        r_b = 2 * m_pad_ * 4
        out_b = 2 * 2 * tn_ * max(C, 1) * 4
        return inter + xn_b + dn_b + r_b + out_b

    m_pad = _round_up(M, tm)
    while (step_bytes(tn, tm, m_pad, False) > _STEP_VMEM_BUDGET
           and tm >= 512 and (tm // 2) % 128 == 0):
        tm //= 2
        m_pad = _round_up(M, tm)
    while (step_bytes(tn, tm, m_pad, False) > _STEP_VMEM_BUDGET
           and tn > 256 and tn % 16 == 0):
        tn //= 2
    n_pad = _round_up(N, tn)
    m_pad = _round_up(M, tm)
    dn_resident = step_bytes(tn, tm, m_pad, True) <= _STEP_VMEM_BUDGET
    return tn, tm, n_pad, m_pad, dn_resident, step_bytes(tn, tm, m_pad,
                                                         dn_resident)


# ----------------------------------------------------------------------------
# Wrapper (padding / transposes / casts are layout glue; math stays in kernels
# except the O(M*E) fold of the p==1 algebraic shortcut).
# ----------------------------------------------------------------------------
def minerva_wrapper2_forward(X, D, r, Wg, bg, Wh, bh, p_factor=1.0):
    """X: (N, feat_dim), D: (M, feat_dim), r: (M, 1) or (M,),
    Wg: (feat_embed_dim, feat_dim), bg: (feat_embed_dim,),
    Wh: (class_embed_dim, 1), bh: (class_embed_dim,).
    Returns {'logits', 'preds'}, both (N, class_embed_dim)."""
    X = jnp.asarray(X, jnp.float32)
    D = jnp.asarray(D, jnp.float32)
    r = jnp.asarray(r, jnp.float32).reshape(-1)
    Wg = jnp.asarray(Wg, jnp.float32)
    bg = jnp.asarray(bg, jnp.float32)
    Wh = jnp.asarray(Wh, jnp.float32)
    bh = jnp.asarray(bh, jnp.float32)

    N, F = X.shape
    M = D.shape[0]
    E = Wg.shape[0]
    C = Wh.shape[0]

    tn, tm, n_pad, m_pad, dn_resident, step_bytes = _choose_tiles(N, M, E, C)

    # Layout glue: bf16 MXU operands, padding to tile multiples, 2-D rows,
    # precomputed r2 = 2r - 1 (zero-padded so padded exemplars contribute 0).
    wg_t = Wg.T.astype(jnp.bfloat16)                                  # (F, E)
    bg2 = bg.reshape(1, E)
    x_pad = jnp.zeros((n_pad, F), jnp.bfloat16).at[:N, :].set(
        X.astype(jnp.bfloat16))
    d_pad = jnp.zeros((m_pad, F), jnp.bfloat16).at[:M, :].set(
        D.astype(jnp.bfloat16))
    r2_row = jnp.zeros((1, m_pad), jnp.float32).at[0, :M].set(r * 2.0 - 1.0)
    wh_row = Wh.reshape(1, C)
    bh_row = bh.reshape(1, C)

    # Stage 1: shared Linear g + L2 normalize, once per side (bf16 outputs).
    xn = _embed_normalize(x_pad, wg_t, bg2, _stage1_rows(n_pad, F, E, cap=tn))
    dn = _embed_normalize(d_pad, wg_t, bg2, _stage1_rows(m_pad, F, E, cap=tm))

    if float(p_factor) == 1.0:
        # Identity activation: echo = Xn @ (Dn^T r2); skip the (N, M) pass.
        w_row = jnp.matmul(r2_row, dn.astype(jnp.float32))            # (1, E)
        logits, preds = _p1_echo_call(xn, w_row, wh_row, bh_row, tn)
    else:
        dn_t = dn.T                                  # (E, m_pad), one-time glue
        logits, preds = _minerva_echo_call(xn, dn_t, r2_row, wh_row, bh_row,
                                           p_factor, tn, tm, dn_resident,
                                           step_bytes)

    return {"logits": logits[:N, :], "preds": preds[:N, :]}


# ----------------------------------------------------------------------------
# Pure-JAX reference mirroring the PyTorch module, for a sanity check.
# ----------------------------------------------------------------------------
def _reference_forward(X, D, r, Wg, bg, Wh, bh, p_factor=1.0):
    r2 = r * 2.0 - 1.0
    Xe = X @ Wg.T + bg
    De = D @ Wg.T + bg
    Xn = Xe / jnp.maximum(jnp.linalg.norm(Xe, axis=1, keepdims=True), 1e-12)
    Dn = De / jnp.maximum(jnp.linalg.norm(De, axis=1, keepdims=True), 1e-12)
    a = Xn @ Dn.T
    s = jnp.abs(a) ** p_factor * jnp.sign(a)
    echo = s @ r2
    logits = echo @ Wh.T + bh
    return logits, jax.nn.sigmoid(logits)


if __name__ == "__main__":
    # Small shapes consistent with the module's forward:
    #   N queries, M stored exemplars, feat_dim input features,
    #   feat_embed_dim for Linear g, class_embed_dim for Linear h.
    N, M = 8, 16
    feat_dim = 32
    feat_embed_dim = 16
    class_embed_dim = 4

    key = jax.random.PRNGKey(0)
    kx, kd, kr, kwg, kbg, kwh, kbh = jax.random.split(key, 7)

    X = jax.random.normal(kx, (N, feat_dim), jnp.float32)
    Dr = jax.random.normal(kd, (M, feat_dim), jnp.float32)           # self.Dr
    r = jax.random.uniform(kr, (M, 1), jnp.float32)                  # self.r in [0,1]
    Wg = jax.random.normal(kwg, (feat_embed_dim, feat_dim), jnp.float32) * 0.1
    bg = jax.random.normal(kbg, (feat_embed_dim,), jnp.float32) * 0.1
    Wh = jax.random.normal(kwh, (class_embed_dim, 1), jnp.float32) * 0.1
    bh = jax.random.normal(kbh, (class_embed_dim,), jnp.float32) * 0.1

    ok = True
    # Cover: algebraic p==1 fast path, integer, half-integer, and generic p.
    for p_factor in (1.0, 2.0, 1.5, 1.3):
        out = minerva_wrapper2_forward(X, Dr, r, Wg, bg, Wh, bh,
                                       p_factor=p_factor)
        out = jax.block_until_ready(out)
        ref_logits, ref_preds = _reference_forward(X, Dr, r, Wg, bg, Wh, bh,
                                                   p_factor)
        ok &= bool(jnp.allclose(out["logits"], ref_logits, atol=2e-2, rtol=2e-2))
        ok &= bool(jnp.allclose(out["preds"], ref_preds, atol=2e-2, rtol=2e-2))

    assert ok
    print("KERNEL_OK")
</pallas_src>

<mosaic_0001>
module attributes {stable_mosaic.version = 11 : i64} {
  func.func @_embed_norm_kernel(%arg0: i32, %arg1: memref<8x32xbf16, #tpu.memory_space<vmem>>, %arg2: memref<32x16xbf16, #tpu.memory_space<vmem>>, %arg3: memref<1x16xf32, #tpu.memory_space<vmem>>, %arg4: memref<8x16xbf16, #tpu.memory_space<vmem>>) attributes {dimension_semantics = [#tpu.dimension_semantics<parallel>], iteration_bounds = array<i64: 1>, scalar_prefetch = 0 : i64, scratch_operands = 0 : i64, tpu.core_type = #tpu.core_type<tc>, window_params = [{transform_indices = @transform_0, window_bounds = array<i64: 8, 32>}, {pipeline_mode = #tpu.pipeline_mode<synchronous>, transform_indices = @transform_1, window_bounds = array<i64: 32, 16>}, {pipeline_mode = #tpu.pipeline_mode<synchronous>, transform_indices = @transform_2, window_bounds = array<i64: 1, 16>}, {transform_indices = @transform_3, window_bounds = array<i64: 8, 16>}]} {
    %c0 = arith.constant 0 : index
    %c0_0 = arith.constant 0 : index
    %0 = vector.load %arg1[%c0, %c0_0] : memref<8x32xbf16, #tpu.memory_space<vmem>>, vector<8x32xbf16>
    %c0_1 = arith.constant 0 : index
    %c0_2 = arith.constant 0 : index
    %1 = vector.load %arg2[%c0_1, %c0_2] : memref<32x16xbf16, #tpu.memory_space<vmem>>, vector<32x16xbf16>
    %cst = arith.constant dense<0.000000e+00> : vector<8x16xf32>
    %2 = tpu.matmul %0, %1, %cst {dimension_numbers = #tpu.dot_dimension_numbers<[1], [0], [0], [1], [0, 0, 1, 1], [], []>} : vector<8x32xbf16>, vector<32x16xbf16>, vector<8x16xf32> -> vector<8x16xf32>
    %c0_3 = arith.constant 0 : index
    %c0_4 = arith.constant 0 : index
    %3 = vector.load %arg3[%c0_3, %c0_4] : memref<1x16xf32, #tpu.memory_space<vmem>>, vector<1x16xf32>
    %4 = vector.broadcast %3 : vector<1x16xf32> to vector<8x16xf32>
    %5 = arith.addf %2, %4 : vector<8x16xf32>
    %6 = arith.mulf %5, %5 : vector<8x16xf32>
    %cst_5 = arith.constant dense<0.000000e+00> : vector<8xf32>
    %7 = vector.multi_reduction <add>, %6, %cst_5 [1] : vector<8x16xf32> to vector<8xf32>
    %8 = vector.shape_cast %7 : vector<8xf32> to vector<8x1xf32>
    %cst_6 = arith.constant 1.000000e-24 : f32
    %9 = vector.broadcast %cst_6 : f32 to vector<8x1xf32>
    %10 = arith.maximumf %8, %9 : vector<8x1xf32>
    %11 = math.rsqrt %10 : vector<8x1xf32>
    %12 = vector.broadcast %11 : vector<8x1xf32> to vector<8x16xf32>
    %13 = arith.mulf %5, %12 : vector<8x16xf32>
    %14 = arith.truncf %13 : vector<8x16xf32> to vector<8x16xbf16>
    %c0_7 = arith.constant 0 : index
    %c0_8 = arith.constant 0 : index
    %15 = vector.load %arg4[%c0_7, %c0_8] : memref<8x16xbf16, #tpu.memory_space<vmem>>, vector<8x16xbf16>
    tpu.vector_store %arg4[%c0_7, %c0_8], %14 {strides = array<i32>} : memref<8x16xbf16, #tpu.memory_space<vmem>>, vector<8x16xbf16>,
    return
  }
  func.func @transform_0(%arg0: i32) -> (i32, i32) {
    %c0_i32 = arith.constant 0 : i32
    %c0_i32_0 = arith.constant 0 : i32
    return %arg0, %c0_i32 : i32, i32
  }
  func.func @transform_1(%arg0: i32) -> (i32, i32) {
    %c0_i32 = arith.constant 0 : i32
    %c0_i32_0 = arith.constant 0 : i32
    %c0_i32_1 = arith.constant 0 : i32
    return %c0_i32, %c0_i32_0 : i32, i32
  }
  func.func @transform_2(%arg0: i32) -> (i32, i32) {
    %c0_i32 = arith.constant 0 : i32
    %c0_i32_0 = arith.constant 0 : i32
    %c0_i32_1 = arith.constant 0 : i32
    return %c0_i32, %c0_i32_0 : i32, i32
  }
  func.func @transform_3(%arg0: i32) -> (i32, i32) {
    %c0_i32 = arith.constant 0 : i32
    %c0_i32_0 = arith.constant 0 : i32
    return %arg0, %c0_i32 : i32, i32
  }
}

</mosaic_0001>

<bundles_post_ra>
// kernel: tpu_custom_call.1
= control target key start
LH: loop header
LB: loop body
LE: loop exit
PB: predicated region body
PF: predicated region fallthrough
CT: control target
= control target key end

     0   :  { %s167_s0 = inlined_call_operand.vmem [shape: bf16[8,32], index: 0, kind: input, shape index: {}]   ;;  %s168_s1 = inlined_call_operand.vmem [shape: bf16[32,16], index: 1, kind: input, shape index: {}]   ;;  %s169_s2 = inlined_call_operand.vmem [shape: f32[1,16], index: 2, kind: input, shape index: {}]   ;;  %s170_s3 = inlined_call_operand.hbm [shape: bf16[8,16], index: 3, kind: output, shape index: {}]  }
   0x1   :  { %v100_v0 = vld [vmem:[%s168_s1 + $0x8] sm:$0xff] }
   0x2   :  { %8 = vsyncpa [#allocation3], 0  ;;  %47 = vmatpush.bf16.msra.mxu0 %v100_v0  ;;  %v99_v1 = vld [vmem:[%s168_s1] sm:$0xff]  ;;  %vm37_vm0 = vcmask 261120   ;;  %vm55_vm1 = vcmask 130048   ;;  %s81_s21 = sshll.u32 %s170_s3, 4  ;;  %s82_s21 = int_to_ptr.hbm [resolvable:$true] %s81_s21 }
   0x3   :  { %v16_v2 = vld [vmem:[%s167_s0] sm:$0xf]  ;;  %s131_s0 = smov [#allocation2]   ;;  %vm72_vm5 = vcmask 125952  }
   0x4   :  { %v102_v3 = vld [vmem:[%s169_s2] ss:$0 sm:$0xff]  ;;  %s79_s1 = sshll.u32 %s131_s0, 4  ;;  %s80_s1 = int_to_ptr.vmem [resolvable:$true] %s79_s1 }
   0x6   :  { %48 = vmatpush.bf16.msra.mxu0 %v99_v1 }
   0x9   :  { %98 = vmatmul.msk.bf16.vlgmr.msra.gmra.mxu0 %vm37_vm0, %v16_v2 }
  0x86   :  { %v50_v4 = vpop.f32.mrf.mxu0 }
  0x87   :  { %v51_v5 = vadd.f32 %v102_v3, %v50_v4 }
  0x89   :  { %v54_v6 = vmul.f32 %v51_v5, %v51_v5 }
  0x8b   :  { %v56_v7 = vsel %vm55_vm1, %v54_v6, 0.0 }
  0x8c   :  { %57 = vadd.xlane.f32.xlu0 %v56_v7 }
  0x8e   :  { %v52_v8 = vpop.f32.mrf.mxu0 }
  0xff   :  { %v58_v9 = vpop.xlane.xlu0 %57 }
 0x100   :  { %v59_v10 = vmax.f32 %v58_v9, 1e-24 }
 0x102   :  { %103 = vrsqrt.f32 %v59_v10  ;;  %vm66_vm3 = vweird.f32 %v59_v10 }
 0x108   :  { %v104_v11 = vpop.eup %103 }
 0x109   :  { %v61_v12 = vmul.f32 %v104_v11, %v59_v10  ;;  %vm67_vm2 = vweird.f32 %v104_v11 }
 0x10a   :  { %vm68_vm4 = vmor %vm66_vm3, %vm67_vm2 }
 0x10b   :  { %v62_v13 = vmul.f32 %v104_v11, %v61_v12 }
 0x10d   :  { %v63_v14 = vmul.f32 0.5, %v62_v13 }
 0x10f   :  { %v64_v15 = vsub.f32 1.5, %v63_v14 }
 0x111   :  { %v65_v16 = vmul.f32 %v104_v11, %v64_v15 }
 0x113   :  { %v69_v17 = vsel %vm68_vm4, %v104_v11, %v65_v16 }
 0x114   :  { %v70_v18 = vmul.f32 %v69_v17, %v51_v5 }
 0x116   :  { %v71_v19 = vpack.c.bf16 %v70_v18, %v70_v18 }
 0x118   :  { %73 = vst.msk [vmem:[#allocation2] sm:$0xf] %vm72_vm5, %v71_v19 }
 0x119   :  { %84 = dma.vmem_to_hbm [thread:$0]  %s80_s1, 64, %s82_s21, [#allocation3]  }
 0x11a   :  { %129 = dma.done.wait [#allocation3], 64  }
 0x11b   :  { %130 = vsyncadd [#allocation3], 4294967232 }
 0x11c   :  { %89 = vsyncpa [#allocation3], 1 }

</bundles_post_ra>
